<compile_context>
chip_gen: v5e
topology: v5e:2x2
jax: 0.10.0
libtpu: 0.0.40
codegen_flags: <defaults>
</compile_context>

<pallas_src>
import functools

import jax
import jax.numpy as jnp
import numpy as np
from jax.experimental import pallas as pl
from jax.experimental.pallas import tpu as pltpu


# ----------------------------------------------------------------------------
# Fused Pallas kernel: conv_1x1 -> L dilated-residual layers -> conv_out
# Activation layout inside the kernel: (C, T) per batch element (time on lanes).
# ----------------------------------------------------------------------------

def _refinement_kernel(x_ref, win_ref, bin_ref, wd_ref, bd_ref, wp_ref, bp_ref,
                       wout_ref, bout_ref, f_ref, out_ref, *, use_output):
    x = x_ref[0].astype(jnp.float32)            # (Din, T)
    T = x.shape[-1]
    C = wp_ref.shape[-1]
    num_layers = wd_ref.shape[0]

    def mm(w, v):
        # MXU dot; operands in the weight dtype (f32 or bf16), f32 accumulation.
        return jnp.dot(w, v.astype(w.dtype), preferred_element_type=jnp.float32)

    # ---- input 1x1 conv (or passthrough when use_output=False) --------------
    if use_output:
        act = mm(win_ref[...], x) + bin_ref[...].astype(jnp.float32)    # (C, T)
    else:
        act = x                                  # requires num_dim == num_f_maps

    # Lane (time) index, computed once and reused for every dilation's mask.
    t_idx = jax.lax.broadcasted_iota(jnp.int32, (C, T), 1)

    # ---- dilated residual layers (unrolled; dilation 1, 2, 4, ...) ----------
    for i in range(num_layers):
        d = 2 ** i
        # x[t-d] / x[t+d] with zero padding: XLU lane roll + mask of the d
        # wrapped columns.  No pad scratch, no extra VMEM round trip.
        left = jnp.where(t_idx >= d, pltpu.roll(act, d, axis=1), 0.0)
        right = jnp.where(t_idx < T - d, pltpu.roll(act, T - d, axis=1), 0.0)
        # Fused 3-tap dilated conv: one MXU dot with K = 3C.
        x3 = jnp.concatenate([left, act, right], axis=0)                # (3C, T)
        h = mm(wd_ref[i], x3) + bd_ref[i].astype(jnp.float32)           # (C, T)
        h = jnp.maximum(h, 0.0)                                         # ReLU
        # nn.Dropout == identity (eval mode); 1x1 conv + residual, all resident.
        act = act + mm(wp_ref[i], h) + bp_ref[i].astype(jnp.float32)

    # ---- outputs (lane-dense: last stored dim is T) --------------------------
    f_ref[0] = act.astype(f_ref.dtype)                                   # (C, T)
    out = mm(wout_ref[...], act) + bout_ref[...].astype(jnp.float32)     # (ncls, T)
    out_ref[0] = out.astype(out_ref.dtype)


# ----------------------------------------------------------------------------
# Wrapper
# ----------------------------------------------------------------------------

def _vmem_limit_bytes(block_shapes, weights):
    blocks = sum(int(np.prod(s)) * 4 for s in block_shapes)
    wbytes = sum(int(np.prod(w.shape)) * w.dtype.itemsize for w in weights)
    # 2x for BlockSpec double-buffering + headroom for in-kernel temporaries
    # (act, x3, rolls).  Cap under v7x's 64 MiB/TC physical VMEM.
    budget = 2 * blocks + 2 * wbytes + (8 << 20)
    return int(min(max(budget, 16 << 20), 48 << 20))


def refinement_forward(x_bct, params, *, use_output=True, hier=False,
                       causal_conv=False, compute_dtype=jnp.float32):
    """x_bct: (B, num_dim, T) (PyTorch Conv1d layout).
    Returns (f, out): f (B, num_f_maps, T), out (B, num_classes, T)."""
    if hier:
        # TODO(synk): hier=True branch uses nn.AvgPoold (undefined in torch.nn).
        raise NotImplementedError("hier=True (AvgPool) branch not implemented")
    if causal_conv:
        # TODO(synk): causal_conv=True branch (asymmetric pad + temporal crop).
        raise NotImplementedError("causal_conv=True branch not implemented")

    B, num_dim, T = x_bct.shape
    num_layers, C, _ = params["wd"].shape
    num_classes = params["out_w"].shape[0]
    if not use_output and num_dim != C:
        raise ValueError("use_output=False requires num_dim == num_f_maps "
                         f"(got {num_dim} != {C})")

    x = x_bct.astype(jnp.float32)
    cast = lambda w: w.astype(compute_dtype)   # MXU operand dtype (weights only)
    args = (x,
            cast(params["in_w"]), params["in_b"],
            cast(params["wd"]), params["bd"],
            cast(params["wp"]), params["bp"],
            cast(params["out_w"]), params["out_b"])

    def batch_spec(shape):
        return pl.BlockSpec((1,) + tuple(shape[1:]),
                            lambda b, _n=len(shape) - 1: (b,) + (0,) * _n)

    def full_spec(shape):
        return pl.BlockSpec(tuple(shape), lambda b, _n=len(shape): (0,) * _n)

    in_specs = [batch_spec(x.shape)] + [full_spec(a.shape) for a in args[1:]]
    out_shapes = (jax.ShapeDtypeStruct((B, C, T), jnp.float32),
                  jax.ShapeDtypeStruct((B, num_classes, T), jnp.float32))
    out_specs = (batch_spec((B, C, T)), batch_spec((B, num_classes, T)))

    vmem_limit = _vmem_limit_bytes(
        [(num_dim, T), (C, T), (num_classes, T)], args[1:])

    kernel = functools.partial(_refinement_kernel, use_output=use_output)
    f, out = pl.pallas_call(
        kernel,
        out_shape=out_shapes,
        grid=(B,),
        in_specs=in_specs,
        out_specs=out_specs,
        compiler_params=pltpu.CompilerParams(
            dimension_semantics=("parallel",),   # shard batches across TCs (v7x)
            vmem_limit_bytes=vmem_limit),
    )(*args)
    return f, out


# ----------------------------------------------------------------------------
# Parameter construction (deterministic synthetic init, output-major layout)
# ----------------------------------------------------------------------------

def _uniform(key, shape, fan_in):
    s = 1.0 / np.sqrt(fan_in)
    return jax.random.uniform(key, shape, jnp.float32, -s, s)


def make_refinement_params(key, num_layers, num_f_maps, num_dim, num_classes):
    """Output-major weights; dilated taps prestacked along K:
    wd[i] = [W(t-d) | W(t) | W(t+d)] with shape (C, 3C)."""
    keys = jax.random.split(key, 8)
    C = num_f_maps
    return {
        "in_w": _uniform(keys[0], (C, num_dim), num_dim),
        "in_b": _uniform(keys[1], (C, 1), num_dim),
        "wd": _uniform(keys[2], (num_layers, C, 3 * C), 3 * C),
        "bd": _uniform(keys[3], (num_layers, C, 1), 3 * C),
        "wp": _uniform(keys[4], (num_layers, C, C), C),
        "bp": _uniform(keys[5], (num_layers, C, 1), C),
        "out_w": _uniform(keys[6], (num_classes, C), C),
        "out_b": _uniform(keys[7], (num_classes, 1), C),
    }


# ----------------------------------------------------------------------------
# Pure-jnp reference (same math, same param layout, no Pallas)
# ----------------------------------------------------------------------------

def _ref_refinement(x_bct, params, use_output=True):
    P = jax.lax.Precision.HIGHEST
    x = x_bct.astype(jnp.float32)                       # (B, Din, T)
    if use_output:
        out = jnp.einsum("cd,bdt->bct", params["in_w"], x, precision=P) + params["in_b"]
    else:
        out = x
    L = params["wd"].shape[0]
    T = out.shape[-1]
    for i in range(L):
        d = 2 ** i
        xp = jnp.pad(out, ((0, 0), (0, 0), (d, d)))
        x3 = jnp.concatenate(
            [xp[:, :, 0:T], xp[:, :, d:d + T], xp[:, :, 2 * d:2 * d + T]], axis=1)
        h = jnp.einsum("ck,bkt->bct", params["wd"][i], x3, precision=P) + params["bd"][i]
        h = jnp.maximum(h, 0.0)
        out = out + jnp.einsum("ck,bkt->bct", params["wp"][i], h, precision=P) + params["bp"][i]
    f = out
    o = jnp.einsum("ck,bkt->bct", params["out_w"], f, precision=P) + params["out_b"]
    return f, o


# ----------------------------------------------------------------------------
# Main
# ----------------------------------------------------------------------------

if __name__ == "__main__":
    num_layers = 3      # dilations 1, 2, 4
    num_f_maps = 16
    num_dim = 32
    num_classes = 8
    B, T = 2, 128       # time on the lane axis -> lane-dense stores

    key = jax.random.PRNGKey(0)
    kx, kp = jax.random.split(key)
    x = jax.random.normal(kx, (B, num_dim, T), jnp.float32)   # PyTorch (B, C, T)
    params = make_refinement_params(kp, num_layers, num_f_maps, num_dim, num_classes)

    # f32 path
    f, out = refinement_forward(x, params, use_output=True, hier=False)
    f, out = jax.block_until_ready((f, out))
    assert f.shape == (B, num_f_maps, T), f.shape
    assert out.shape == (B, num_classes, T), out.shape

    f_ref, out_ref = _ref_refinement(x, params, use_output=True)
    np.testing.assert_allclose(np.asarray(f), np.asarray(f_ref), rtol=2e-3, atol=2e-3)
    np.testing.assert_allclose(np.asarray(out), np.asarray(out_ref), rtol=2e-3, atol=2e-3)

    # bf16 MXU-operand path (halved weight/operand footprint; looser tolerance)
    f16, out16 = refinement_forward(x, params, use_output=True, hier=False,
                                    compute_dtype=jnp.bfloat16)
    f16, out16 = jax.block_until_ready((f16, out16))
    np.testing.assert_allclose(np.asarray(f16), np.asarray(f_ref), rtol=5e-2, atol=5e-2)
    np.testing.assert_allclose(np.asarray(out16), np.asarray(out_ref), rtol=5e-2, atol=5e-2)

    print("KERNEL_OK")
</pallas_src>

<mosaic_0001>
module attributes {stable_mosaic.version = 11 : i64} {
  func.func @_refinement_kernel(%arg0: i32, %arg1: memref<1x32x128xf32, #tpu.memory_space<vmem>>, %arg2: memref<16x32xf32, #tpu.memory_space<vmem>>, %arg3: memref<16x1xf32, #tpu.memory_space<vmem>>, %arg4: memref<3x16x48xf32, #tpu.memory_space<vmem>>, %arg5: memref<3x16x1xf32, #tpu.memory_space<vmem>>, %arg6: memref<3x16x16xf32, #tpu.memory_space<vmem>>, %arg7: memref<3x16x1xf32, #tpu.memory_space<vmem>>, %arg8: memref<8x16xf32, #tpu.memory_space<vmem>>, %arg9: memref<8x1xf32, #tpu.memory_space<vmem>>, %arg10: memref<1x16x128xf32, #tpu.memory_space<vmem>>, %arg11: memref<1x8x128xf32, #tpu.memory_space<vmem>>) attributes {dimension_semantics = [#tpu.dimension_semantics<parallel>], iteration_bounds = array<i64: 2>, scalar_prefetch = 0 : i64, scratch_operands = 0 : i64, tpu.core_type = #tpu.core_type<tc>, window_params = [{transform_indices = @transform_0, window_bounds = array<i64: 1, 32, 128>}, {pipeline_mode = #tpu.pipeline_mode<synchronous>, transform_indices = @transform_1, window_bounds = array<i64: 16, 32>}, {pipeline_mode = #tpu.pipeline_mode<synchronous>, transform_indices = @transform_2, window_bounds = array<i64: 16, 1>}, {pipeline_mode = #tpu.pipeline_mode<synchronous>, transform_indices = @transform_3, window_bounds = array<i64: 3, 16, 48>}, {pipeline_mode = #tpu.pipeline_mode<synchronous>, transform_indices = @transform_4, window_bounds = array<i64: 3, 16, 1>}, {pipeline_mode = #tpu.pipeline_mode<synchronous>, transform_indices = @transform_5, window_bounds = array<i64: 3, 16, 16>}, {pipeline_mode = #tpu.pipeline_mode<synchronous>, transform_indices = @transform_6, window_bounds = array<i64: 3, 16, 1>}, {pipeline_mode = #tpu.pipeline_mode<synchronous>, transform_indices = @transform_7, window_bounds = array<i64: 8, 16>}, {pipeline_mode = #tpu.pipeline_mode<synchronous>, transform_indices = @transform_8, window_bounds = array<i64: 8, 1>}, {transform_indices = @transform_9, window_bounds = array<i64: 1, 16, 128>}, {transform_indices = @transform_10, window_bounds = array<i64: 1, 8, 128>}]} {
    %c0 = arith.constant 0 : index
    %c0_0 = arith.constant 0 : index
    %c0_1 = arith.constant 0 : index
    %0 = vector.load %arg1[%c0, %c0_0, %c0_1] : memref<1x32x128xf32, #tpu.memory_space<vmem>>, vector<1x32x128xf32>
    %1 = vector.shape_cast %0 : vector<1x32x128xf32> to vector<32x128xf32>
    %c0_2 = arith.constant 0 : index
    %c0_3 = arith.constant 0 : index
    %2 = vector.load %arg2[%c0_2, %c0_3] : memref<16x32xf32, #tpu.memory_space<vmem>>, vector<16x32xf32>
    %cst = arith.constant dense<0.000000e+00> : vector<16x128xf32>
    %3 = tpu.matmul %2, %1, %cst {dimension_numbers = #tpu.dot_dimension_numbers<[1], [0], [0], [1], [0, 0, 1, 1], [], []>} : vector<16x32xf32>, vector<32x128xf32>, vector<16x128xf32> -> vector<16x128xf32>
    %c0_4 = arith.constant 0 : index
    %c0_5 = arith.constant 0 : index
    %4 = vector.load %arg3[%c0_4, %c0_5] : memref<16x1xf32, #tpu.memory_space<vmem>>, vector<16x1xf32>
    %5 = vector.broadcast %4 : vector<16x1xf32> to vector<16x128xf32>
    %6 = arith.addf %3, %5 : vector<16x128xf32>
    %7 = tpu.iota {dimensions = array<i32: 1>} : vector<16x128xi32>
    %c1_i32 = arith.constant 1 : i32
    %8 = vector.broadcast %c1_i32 : i32 to vector<16x128xi32>
    %9 = arith.cmpi sge, %7, %8 : vector<16x128xi32>
    %c1_i32_6 = arith.constant 1 : i32
    %10 = tpu.dynamic_rotate %6 by %c1_i32_6 dim 1 : vector<16x128xf32>, i32 -> vector<16x128xf32>
    %cst_7 = arith.constant 0.000000e+00 : f32
    %11 = vector.broadcast %cst_7 : f32 to vector<16x128xf32>
    %12 = arith.select %9, %10, %11 : vector<16x128xi1>, vector<16x128xf32>
    %c127_i32 = arith.constant 127 : i32
    %13 = vector.broadcast %c127_i32 : i32 to vector<16x128xi32>
    %14 = arith.cmpi slt, %7, %13 : vector<16x128xi32>
    %c127_i32_8 = arith.constant 127 : i32
    %15 = tpu.dynamic_rotate %6 by %c127_i32_8 dim 1 : vector<16x128xf32>, i32 -> vector<16x128xf32>
    %cst_9 = arith.constant 0.000000e+00 : f32
    %16 = vector.broadcast %cst_9 : f32 to vector<16x128xf32>
    %17 = arith.select %14, %15, %16 : vector<16x128xi1>, vector<16x128xf32>
    %18 = tpu.concatenate %12, %6, %17 in 0 : vector<16x128xf32>, vector<16x128xf32>, vector<16x128xf32> -> vector<48x128xf32>
    %c0_10 = arith.constant 0 : index
    %c0_11 = arith.constant 0 : index
    %c0_12 = arith.constant 0 : index
    %19 = vector.load %arg4[%c0_10, %c0_11, %c0_12] : memref<3x16x48xf32, #tpu.memory_space<vmem>>, vector<1x16x48xf32>
    %20 = vector.shape_cast %19 : vector<1x16x48xf32> to vector<16x48xf32>
    %cst_13 = arith.constant dense<0.000000e+00> : vector<16x128xf32>
    %21 = tpu.matmul %20, %18, %cst_13 {dimension_numbers = #tpu.dot_dimension_numbers<[1], [0], [0], [1], [0, 0, 1, 1], [], []>} : vector<16x48xf32>, vector<48x128xf32>, vector<16x128xf32> -> vector<16x128xf32>
    %c0_14 = arith.constant 0 : index
    %c0_15 = arith.constant 0 : index
    %c0_16 = arith.constant 0 : index
    %22 = vector.load %arg5[%c0_14, %c0_15, %c0_16] : memref<3x16x1xf32, #tpu.memory_space<vmem>>, vector<1x16x1xf32>
    %23 = vector.shape_cast %22 : vector<1x16x1xf32> to vector<16x1xf32>
    %24 = vector.broadcast %23 : vector<16x1xf32> to vector<16x128xf32>
    %25 = arith.addf %21, %24 : vector<16x128xf32>
    %cst_17 = arith.constant 0.000000e+00 : f32
    %26 = vector.broadcast %cst_17 : f32 to vector<16x128xf32>
    %27 = arith.maximumf %25, %26 : vector<16x128xf32>
    %c0_18 = arith.constant 0 : index
    %c0_19 = arith.constant 0 : index
    %c0_20 = arith.constant 0 : index
    %28 = vector.load %arg6[%c0_18, %c0_19, %c0_20] : memref<3x16x16xf32, #tpu.memory_space<vmem>>, vector<1x16x16xf32>
    %29 = vector.shape_cast %28 : vector<1x16x16xf32> to vector<16x16xf32>
    %cst_21 = arith.constant dense<0.000000e+00> : vector<16x128xf32>
    %30 = tpu.matmul %29, %27, %cst_21 {dimension_numbers = #tpu.dot_dimension_numbers<[1], [0], [0], [1], [0, 0, 1, 1], [], []>} : vector<16x16xf32>, vector<16x128xf32>, vector<16x128xf32> -> vector<16x128xf32>
    %31 = arith.addf %6, %30 : vector<16x128xf32>
    %c0_22 = arith.constant 0 : index
    %c0_23 = arith.constant 0 : index
    %c0_24 = arith.constant 0 : index
    %32 = vector.load %arg7[%c0_22, %c0_23, %c0_24] : memref<3x16x1xf32, #tpu.memory_space<vmem>>, vector<1x16x1xf32>
    %33 = vector.shape_cast %32 : vector<1x16x1xf32> to vector<16x1xf32>
    %34 = vector.broadcast %33 : vector<16x1xf32> to vector<16x128xf32>
    %35 = arith.addf %31, %34 : vector<16x128xf32>
    %c2_i32 = arith.constant 2 : i32
    %36 = vector.broadcast %c2_i32 : i32 to vector<16x128xi32>
    %37 = arith.cmpi sge, %7, %36 : vector<16x128xi32>
    %c2_i32_25 = arith.constant 2 : i32
    %38 = tpu.dynamic_rotate %35 by %c2_i32_25 dim 1 : vector<16x128xf32>, i32 -> vector<16x128xf32>
    %cst_26 = arith.constant 0.000000e+00 : f32
    %39 = vector.broadcast %cst_26 : f32 to vector<16x128xf32>
    %40 = arith.select %37, %38, %39 : vector<16x128xi1>, vector<16x128xf32>
    %c126_i32 = arith.constant 126 : i32
    %41 = vector.broadcast %c126_i32 : i32 to vector<16x128xi32>
    %42 = arith.cmpi slt, %7, %41 : vector<16x128xi32>
    %c126_i32_27 = arith.constant 126 : i32
    %43 = tpu.dynamic_rotate %35 by %c126_i32_27 dim 1 : vector<16x128xf32>, i32 -> vector<16x128xf32>
    %cst_28 = arith.constant 0.000000e+00 : f32
    %44 = vector.broadcast %cst_28 : f32 to vector<16x128xf32>
    %45 = arith.select %42, %43, %44 : vector<16x128xi1>, vector<16x128xf32>
    %46 = tpu.concatenate %40, %35, %45 in 0 : vector<16x128xf32>, vector<16x128xf32>, vector<16x128xf32> -> vector<48x128xf32>
    %c1 = arith.constant 1 : index
    %c0_29 = arith.constant 0 : index
    %c0_30 = arith.constant 0 : index
    %47 = vector.load %arg4[%c1, %c0_29, %c0_30] : memref<3x16x48xf32, #tpu.memory_space<vmem>>, vector<1x16x48xf32>
    %48 = vector.shape_cast %47 : vector<1x16x48xf32> to vector<16x48xf32>
    %cst_31 = arith.constant dense<0.000000e+00> : vector<16x128xf32>
    %49 = tpu.matmul %48, %46, %cst_31 {dimension_numbers = #tpu.dot_dimension_numbers<[1], [0], [0], [1], [0, 0, 1, 1], [], []>} : vector<16x48xf32>, vector<48x128xf32>, vector<16x128xf32> -> vector<16x128xf32>
    %c1_32 = arith.constant 1 : index
    %c0_33 = arith.constant 0 : index
    %c0_34 = arith.constant 0 : index
    %50 = vector.load %arg5[%c1_32, %c0_33, %c0_34] : memref<3x16x1xf32, #tpu.memory_space<vmem>>, vector<1x16x1xf32>
    %51 = vector.shape_cast %50 : vector<1x16x1xf32> to vector<16x1xf32>
    %52 = vector.broadcast %51 : vector<16x1xf32> to vector<16x128xf32>
    %53 = arith.addf %49, %52 : vector<16x128xf32>
    %cst_35 = arith.constant 0.000000e+00 : f32
    %54 = vector.broadcast %cst_35 : f32 to vector<16x128xf32>
    %55 = arith.maximumf %53, %54 : vector<16x128xf32>
    %c1_36 = arith.constant 1 : index
    %c0_37 = arith.constant 0 : index
    %c0_38 = arith.constant 0 : index
    %56 = vector.load %arg6[%c1_36, %c0_37, %c0_38] : memref<3x16x16xf32, #tpu.memory_space<vmem>>, vector<1x16x16xf32>
    %57 = vector.shape_cast %56 : vector<1x16x16xf32> to vector<16x16xf32>
    %cst_39 = arith.constant dense<0.000000e+00> : vector<16x128xf32>
    %58 = tpu.matmul %57, %55, %cst_39 {dimension_numbers = #tpu.dot_dimension_numbers<[1], [0], [0], [1], [0, 0, 1, 1], [], []>} : vector<16x16xf32>, vector<16x128xf32>, vector<16x128xf32> -> vector<16x128xf32>
    %59 = arith.addf %35, %58 : vector<16x128xf32>
    %c1_40 = arith.constant 1 : index
    %c0_41 = arith.constant 0 : index
    %c0_42 = arith.constant 0 : index
    %60 = vector.load %arg7[%c1_40, %c0_41, %c0_42] : memref<3x16x1xf32, #tpu.memory_space<vmem>>, vector<1x16x1xf32>
    %61 = vector.shape_cast %60 : vector<1x16x1xf32> to vector<16x1xf32>
    %62 = vector.broadcast %61 : vector<16x1xf32> to vector<16x128xf32>
    %63 = arith.addf %59, %62 : vector<16x128xf32>
    %c4_i32 = arith.constant 4 : i32
    %64 = vector.broadcast %c4_i32 : i32 to vector<16x128xi32>
    %65 = arith.cmpi sge, %7, %64 : vector<16x128xi32>
    %c4_i32_43 = arith.constant 4 : i32
    %66 = tpu.dynamic_rotate %63 by %c4_i32_43 dim 1 : vector<16x128xf32>, i32 -> vector<16x128xf32>
    %cst_44 = arith.constant 0.000000e+00 : f32
    %67 = vector.broadcast %cst_44 : f32 to vector<16x128xf32>
    %68 = arith.select %65, %66, %67 : vector<16x128xi1>, vector<16x128xf32>
    %c124_i32 = arith.constant 124 : i32
    %69 = vector.broadcast %c124_i32 : i32 to vector<16x128xi32>
    %70 = arith.cmpi slt, %7, %69 : vector<16x128xi32>
    %c124_i32_45 = arith.constant 124 : i32
    %71 = tpu.dynamic_rotate %63 by %c124_i32_45 dim 1 : vector<16x128xf32>, i32 -> vector<16x128xf32>
    %cst_46 = arith.constant 0.000000e+00 : f32
    %72 = vector.broadcast %cst_46 : f32 to vector<16x128xf32>
    %73 = arith.select %70, %71, %72 : vector<16x128xi1>, vector<16x128xf32>
    %74 = tpu.concatenate %68, %63, %73 in 0 : vector<16x128xf32>, vector<16x128xf32>, vector<16x128xf32> -> vector<48x128xf32>
    %c2 = arith.constant 2 : index
    %c0_47 = arith.constant 0 : index
    %c0_48 = arith.constant 0 : index
    %75 = vector.load %arg4[%c2, %c0_47, %c0_48] : memref<3x16x48xf32, #tpu.memory_space<vmem>>, vector<1x16x48xf32>
    %76 = vector.shape_cast %75 : vector<1x16x48xf32> to vector<16x48xf32>
    %cst_49 = arith.constant dense<0.000000e+00> : vector<16x128xf32>
    %77 = tpu.matmul %76, %74, %cst_49 {dimension_numbers = #tpu.dot_dimension_numbers<[1], [0], [0], [1], [0, 0, 1, 1], [], []>} : vector<16x48xf32>, vector<48x128xf32>, vector<16x128xf32> -> vector<16x128xf32>
    %c2_50 = arith.constant 2 : index
    %c0_51 = arith.constant 0 : index
    %c0_52 = arith.constant 0 : index
    %78 = vector.load %arg5[%c2_50, %c0_51, %c0_52] : memref<3x16x1xf32, #tpu.memory_space<vmem>>, vector<1x16x1xf32>
    %79 = vector.shape_cast %78 : vector<1x16x1xf32> to vector<16x1xf32>
    %80 = vector.broadcast %79 : vector<16x1xf32> to vector<16x128xf32>
    %81 = arith.addf %77, %80 : vector<16x128xf32>
    %cst_53 = arith.constant 0.000000e+00 : f32
    %82 = vector.broadcast %cst_53 : f32 to vector<16x128xf32>
    %83 = arith.maximumf %81, %82 : vector<16x128xf32>
    %c2_54 = arith.constant 2 : index
    %c0_55 = arith.constant 0 : index
    %c0_56 = arith.constant 0 : index
    %84 = vector.load %arg6[%c2_54, %c0_55, %c0_56] : memref<3x16x16xf32, #tpu.memory_space<vmem>>, vector<1x16x16xf32>
    %85 = vector.shape_cast %84 : vector<1x16x16xf32> to vector<16x16xf32>
    %cst_57 = arith.constant dense<0.000000e+00> : vector<16x128xf32>
    %86 = tpu.matmul %85, %83, %cst_57 {dimension_numbers = #tpu.dot_dimension_numbers<[1], [0], [0], [1], [0, 0, 1, 1], [], []>} : vector<16x16xf32>, vector<16x128xf32>, vector<16x128xf32> -> vector<16x128xf32>
    %87 = arith.addf %63, %86 : vector<16x128xf32>
    %c2_58 = arith.constant 2 : index
    %c0_59 = arith.constant 0 : index
    %c0_60 = arith.constant 0 : index
    %88 = vector.load %arg7[%c2_58, %c0_59, %c0_60] : memref<3x16x1xf32, #tpu.memory_space<vmem>>, vector<1x16x1xf32>
    %89 = vector.shape_cast %88 : vector<1x16x1xf32> to vector<16x1xf32>
    %90 = vector.broadcast %89 : vector<16x1xf32> to vector<16x128xf32>
    %91 = arith.addf %87, %90 : vector<16x128xf32>
    %c0_61 = arith.constant 0 : index
    %c0_62 = arith.constant 0 : index
    %c0_63 = arith.constant 0 : index
    %92 = vector.load %arg10[%c0_61, %c0_62, %c0_63] : memref<1x16x128xf32, #tpu.memory_space<vmem>>, vector<1x16x128xf32>
    %93 = vector.shape_cast %92 : vector<1x16x128xf32> to vector<16x128xf32>
    %94 = vector.shape_cast %91 : vector<16x128xf32> to vector<1x16x128xf32>
    tpu.vector_store %arg10[%c0_61, %c0_62, %c0_63], %94 {strides = array<i32>} : memref<1x16x128xf32, #tpu.memory_space<vmem>>, vector<1x16x128xf32>,
    %c0_64 = arith.constant 0 : index
    %c0_65 = arith.constant 0 : index
    %95 = vector.load %arg8[%c0_64, %c0_65] : memref<8x16xf32, #tpu.memory_space<vmem>>, vector<8x16xf32>
    %cst_66 = arith.constant dense<0.000000e+00> : vector<8x128xf32>
    %96 = tpu.matmul %95, %91, %cst_66 {dimension_numbers = #tpu.dot_dimension_numbers<[1], [0], [0], [1], [0, 0, 1, 1], [], []>} : vector<8x16xf32>, vector<16x128xf32>, vector<8x128xf32> -> vector<8x128xf32>
    %c0_67 = arith.constant 0 : index
    %c0_68 = arith.constant 0 : index
    %97 = vector.load %arg9[%c0_67, %c0_68] : memref<8x1xf32, #tpu.memory_space<vmem>>, vector<8x1xf32>
    %98 = vector.broadcast %97 : vector<8x1xf32> to vector<8x128xf32>
    %99 = arith.addf %96, %98 : vector<8x128xf32>
    %c0_69 = arith.constant 0 : index
    %c0_70 = arith.constant 0 : index
    %c0_71 = arith.constant 0 : index
    %100 = vector.load %arg11[%c0_69, %c0_70, %c0_71] : memref<1x8x128xf32, #tpu.memory_space<vmem>>, vector<1x8x128xf32>
    %101 = vector.shape_cast %100 : vector<1x8x128xf32> to vector<8x128xf32>
    %102 = vector.shape_cast %99 : vector<8x128xf32> to vector<1x8x128xf32>
    tpu.vector_store %arg11[%c0_69, %c0_70, %c0_71], %102 {strides = array<i32>} : memref<1x8x128xf32, #tpu.memory_space<vmem>>, vector<1x8x128xf32>,
    return
  }
  func.func @transform_0(%arg0: i32) -> (i32, i32, i32) {
    %c0_i32 = arith.constant 0 : i32
    %c0_i32_0 = arith.constant 0 : i32
    %c0_i32_1 = arith.constant 0 : i32
    return %arg0, %c0_i32, %c0_i32_0 : i32, i32, i32
  }
  func.func @transform_1(%arg0: i32) -> (i32, i32) {
    %c0_i32 = arith.constant 0 : i32
    %c0_i32_0 = arith.constant 0 : i32
    %c0_i32_1 = arith.constant 0 : i32
    return %c0_i32, %c0_i32_0 : i32, i32
  }
  func.func @transform_2(%arg0: i32) -> (i32, i32) {
    %c0_i32 = arith.constant 0 : i32
    %c0_i32_0 = arith.constant 0 : i32
    %c0_i32_1 = arith.constant 0 : i32
    return %c0_i32, %c0_i32_0 : i32, i32
  }
  func.func @transform_3(%arg0: i32) -> (i32, i32, i32) {
    %c0_i32 = arith.constant 0 : i32
    %c0_i32_0 = arith.constant 0 : i32
    %c0_i32_1 = arith.constant 0 : i32
    %c0_i32_2 = arith.constant 0 : i32
    return %c0_i32, %c0_i32_0, %c0_i32_1 : i32, i32, i32
  }
  func.func @transform_4(%arg0: i32) -> (i32, i32, i32) {
    %c0_i32 = arith.constant 0 : i32
    %c0_i32_0 = arith.constant 0 : i32
    %c0_i32_1 = arith.constant 0 : i32
    %c0_i32_2 = arith.constant 0 : i32
    return %c0_i32, %c0_i32_0, %c0_i32_1 : i32, i32, i32
  }
  func.func @transform_5(%arg0: i32) -> (i32, i32, i32) {
    %c0_i32 = arith.constant 0 : i32
    %c0_i32_0 = arith.constant 0 : i32
    %c0_i32_1 = arith.constant 0 : i32
    %c0_i32_2 = arith.constant 0 : i32
    return %c0_i32, %c0_i32_0, %c0_i32_1 : i32, i32, i32
  }
  func.func @transform_6(%arg0: i32) -> (i32, i32, i32) {
    %c0_i32 = arith.constant 0 : i32
    %c0_i32_0 = arith.constant 0 : i32
    %c0_i32_1 = arith.constant 0 : i32
    %c0_i32_2 = arith.constant 0 : i32
    return %c0_i32, %c0_i32_0, %c0_i32_1 : i32, i32, i32
  }
  func.func @transform_7(%arg0: i32) -> (i32, i32) {
    %c0_i32 = arith.constant 0 : i32
    %c0_i32_0 = arith.constant 0 : i32
    %c0_i32_1 = arith.constant 0 : i32
    return %c0_i32, %c0_i32_0 : i32, i32
  }
  func.func @transform_8(%arg0: i32) -> (i32, i32) {
    %c0_i32 = arith.constant 0 : i32
    %c0_i32_0 = arith.constant 0 : i32
    %c0_i32_1 = arith.constant 0 : i32
    return %c0_i32, %c0_i32_0 : i32, i32
  }
  func.func @transform_9(%arg0: i32) -> (i32, i32, i32) {
    %c0_i32 = arith.constant 0 : i32
    %c0_i32_0 = arith.constant 0 : i32
    %c0_i32_1 = arith.constant 0 : i32
    return %arg0, %c0_i32, %c0_i32_0 : i32, i32, i32
  }
  func.func @transform_10(%arg0: i32) -> (i32, i32, i32) {
    %c0_i32 = arith.constant 0 : i32
    %c0_i32_0 = arith.constant 0 : i32
    %c0_i32_1 = arith.constant 0 : i32
    return %arg0, %c0_i32, %c0_i32_0 : i32, i32, i32
  }
}

</mosaic_0001>

<bundles_post_ra>
// kernel: tpu_custom_call.1
= control target key start
LH: loop header
LB: loop body
LE: loop exit
PB: predicated region body
PF: predicated region fallthrough
CT: control target
= control target key end

     0   :  { %s1554_s0 = inlined_call_operand.vmem [shape: f32[2,32,128], index: 0, kind: input, shape index: {}]   ;;  %s1555_s1 = inlined_call_operand.hbm [shape: f32[16,32], index: 1, kind: input, shape index: {}]   ;;  %s1556_s2 = inlined_call_operand.vmem [shape: f32[16,1], index: 2, kind: input, shape index: {}]   ;;  %s1557_s3 = inlined_call_operand.vmem [shape: f32[3,16,48], index: 3, kind: input, shape index: {}]   ;;  %s1558_s4 = inlined_call_operand.vmem [shape: f32[3,16,1], index: 4, kind: input, shape index: {}]   ;;  %s1559_s5 = inlined_call_operand.hbm [shape: f32[3,16,16], index: 5, kind: input, shape index: {}]   ;;  %s1560_s6 = inlined_call_operand.vmem [shape: f32[3,16,1], index: 6, kind: input, shape index: {}]   ;;  %s1561_s7 = inlined_call_operand.vmem [shape: f32[8,16], index: 7, kind: input, shape index: {}]   ;;  %s1562_s8 = inlined_call_operand.vmem [shape: f32[8,1], index: 8, kind: input, shape index: {}]   ;;  %s1563_s9 = inlined_call_operand.hbm [shape: f32[2,16,128], index: 9, kind: output, shape index: {0}]   ;;  %s1564_s10 = inlined_call_operand.hbm [shape: f32[2,8,128], index: 10, kind: output, shape index: {1}]  }
   0x1   :  { %1565 = sst [smem:[#allocation15_spill]] %s1554_s0 }
   0x2   :  { %1566 = sst [smem:[#allocation16_spill]] %s1555_s1 }
   0x3   :  { %1567 = sst [smem:[#allocation17_spill]] %s1556_s2 }
   0x4   :  { %1568 = sst [smem:[#allocation18_spill]] %s1557_s3 }
   0x5   :  { %16 = vsyncpa [#allocation3], 0 }
   0x6   :  { %17 = vsyncpa [#allocation6], 0 }
   0x7   :  { %18 = vsyncpa [#allocation4], 0 }
   0x8   :  { %20 = vsyncpa [#allocation4 + $0x1], 0 }
   0x9   :  { %21 = vsyncpa [#allocation9], 0 }
   0xa   :  { %23 = vsyncpa [#allocation9 + $0x1], 0  ;;  %s1337_s13 = smov 0   ;;  %s1339_s14 = smov 0  }
   0xb   :  { %s1341_s15 = smov 0   ;;  %s1343_s16 = smov 0  }
   0xc LB: > { %s1358_s17 = sadd.s32 4294967295, %s1267_s16   ;;  %s966_s18 = sadd.s32 4294967294, %s1267_s16   ;;  %s1267_s16 = sphi %s1343_s16, %s1581_s16   ;;  %s1263_s15 = sphi %s1341_s15, %s1580_s15   ;;  %s1259_s14 = sphi %s1339_s14, %s1579_s14   ;;  %s1255_s13 = sphi %s1337_s13, %s1578_s13  }
   0xd   : > { %s1362_s19 = sadd.s32 1, %s1267_s16   ;;  %s230_s20 = sadd.s32 1, %s1263_s15 }
   0xe   : > { %s227_s21 = ssub.s32 %s1267_s16, %s1362_s19  ;;  %p240_p0 = scmp.ne.s32.totalorder %s1263_s15, %s1259_s14 }
   0xf   : > { %p228_p1 = scmp.eq.s32.totalorder %s227_s21, 0  ;;  %p241_p2 = scmp.eq.s32.totalorder %s1358_s17, 1 }
  0x10   : > { %p246_p3 = scmp.ne.s32.totalorder %s1259_s14, %s1255_s13  ;;  %p247_p4 = scmp.eq.s32.totalorder %s966_s18, 1 }
  0x11   : > { %s1373_s22 = scalar_select %p228_p1, %s1263_s15, %s230_s20  }
  0x12   : > { %p1375_p5 = por %p241_p2, %p240_p0  ;;  %p1379_p6 = por %p247_p4, %p246_p3 }
  0x13   : > { %1569 = sst [smem:[#allocation14_spill]] %s1373_s22  ;;  %p967_p7 = scmp.ge.s32.totalorder %s1267_s16, 1 }
  0x14   : > { %p280_p8 = scmp.lt.s32.totalorder %s1267_s16, 3  ;;  %p1052_p9 = scmp.eq.s32.totalorder %s1358_s17, 0 }
  0x15   : > { %s1573_s1 = sld [smem:[#allocation16_spill]]  ;;  %s1269_s29 = smov [#allocation2]  }
  0x16   : > { %p1386_p10 = pnand %p967_p7, %p280_p8  ;;  %s293_s30 = sshll.u32 %s1269_s29, 4  ;;  %s294_s30 = int_to_ptr.vmem [resolvable:$true] %s293_s30 }
  0x17   : > { %s314_s18 = sshll.u32 %s1559_s5, 4  ;;  %s1270_s20 = smov 128   ;;  %s315_s18 = int_to_ptr.hbm [resolvable:$true] %s314_s18 }
  0x18   : > { %p1038_p11 = pneg %p1386_p10  ;;  %s1271_s21 = smov 8  }
  0x19   : > { %s1272_s22 = smov [#allocation5]   ;;  %349 = sbr.rel (%p1386_p10) target bundleno = 1565 (0x61d), region = 56 }
  0x1a   : > { %p1039_p12 = pnand %p1052_p9, %p1038_p11  ;;  %s316_s26 = sshll.u32 %s1272_s22, 4  ;;  %s317_s26 = int_to_ptr.vmem [resolvable:$true] %s316_s26 }
  0x1b   : > { %s291_s28 = sshll.u32 %s1573_s1, 4  ;;  %s292_s28 = int_to_ptr.hbm [resolvable:$true] %s291_s28 }
  0x1c   : > { %1041 = dma.hbm_to_vmem [thread:$0]  (!%p1039_p12), %s292_s28, 256, %s294_s30, [#allocation3], %s1270_s20, %s1270_s20, %s1271_s21  }
  0x1d   : > { %1044 = dma.hbm_to_vmem [thread:$0]  (!%p1039_p12), %s315_s18, 768, %s317_s26, [#allocation6], %s1270_s20, %s1270_s20, %s1271_s21  }
  0x1e   : > { %1238 = dma.done.wait (%p1052_p9), [#allocation3], 256  }
  0x1f   : > { %1240 = vsyncadd (%p1052_p9), [#allocation3], 4294967040 }
  0x20   : > { %1242 = dma.done.wait (%p1052_p9), [#allocation6], 768  }
  0x21   : > { %1244 = vsyncadd (%p1052_p9), [#allocation6], 4294966528  ;;  %p398_p13 = scmp.lt.s32.totalorder %s1358_s17, 1  ;;  %v1273_v0 = vmov 0   ;;  %s1574_s0 = sld [smem:[#allocation15_spill]]  ;;  %v407_v6 = vld [vmem:[#allocation2] sm:$0xff]  ;;  %v451_v17 = vlaneseq }
  0x22   : > { %1102 = vset.pattern.permute.xlu0 %v1273_v0  ;;  %1103 = vset.pattern.permute.xlu1 %v1273_v0  ;;  %s1575_s2 = sld [smem:[#allocation17_spill]]  ;;  %vm421_vm0 = vcmask 261120   ;;  %v408_v8 = vld [vmem:[#allocation2 + $0x8] sm:$0xff]  ;;  %v547_v10 = vld [vmem:[%s1560_s6] sm:$0xff]  ;;  %s1275_s27 = smov 127   ;;  %vm481_vm3 = vcmask 392192  }
  0x23   : > { %s399_s22 = scalar_select %p398_p13, %s1358_s17, 1  ;;  %1104 = vset.pattern.permute.xlu2 %v1273_v0  ;;  %v470_v9 = vld [vmem:[%s1558_s4 + $0x8] sm:$0xff]  ;;  %v1427_v18 = vand.u32 127, %v451_v17  ;;  %v469_v19 = vld [vmem:[%s1558_s4] sm:$0xff]  ;;  %v513_v35 = vld [vmem:[#allocation5] sm:$0xff]  ;;  %vm515_vm4 = vcmask 130048  }
  0x24   : > { %s1576_s3 = sld [smem:[#allocation18_spill]]  ;;  %v548_v26 = vld [vmem:[%s1560_s6 + $0x8] sm:$0xff]  ;;  %v514_v36 = vld [vmem:[#allocation5 + $0x8] sm:$0xff]  ;;  %s1276_s26 = smov 126   ;;  %v1000_v46 = vld [vmem:[%s1560_s6 + $0x10] sm:$0xff] }
  0x25   : > { %s1024_s25 = sshll.u32 %s399_s22, 5  ;;  %vm460_vm1 = vcmp.lt.s32.totalorder %v1427_v18, 127  ;;  %vm453_vm2 = vcmp.ge.s32.totalorder %v1427_v18, 1  ;;  %v991_v44 = vld [vmem:[%s1558_s4 + $0x18] sm:$0xff]  ;;  %v990_v47 = vld [vmem:[%s1558_s4 + $0x10] sm:$0xff]  ;;  %vm568_vm5 = vcmp.lt.s32.totalorder %v1427_v18, 126 }
  0x26   : > { %v1001_v48 = vld [vmem:[%s1560_s6 + $0x18] sm:$0xff]  ;;  %vm561_vm6 = vcmp.ge.s32.totalorder %v1427_v18, 2  ;;  %v623_v63 = vld [vmem:[#allocation5 + $0x10] sm:$0xff]  ;;  %v624_v0 = vld [vmem:[#allocation5 + $0x18] sm:$0xff]  ;;  %vm678_vm7 = vcmp.lt.s32.totalorder %v1427_v18, 124  ;;  %vm671_vm8 = vcmp.ge.s32.totalorder %v1427_v18, 4 }
  0x27   : > { %s402_s29 = scalar_lea.vmem %s1574_s0, %s1024_s25  ;;  %s1274_s25 = smov 1  }
  0x28   : > { %v406_v1 = vld [vmem:[%s402_s29 + $0x18] sm:$0xff]  ;;  %v410_v2 = vld [vmem:[%s1575_s2 + $0x8] sm:$0xff]  ;;  %v405_v3 = vld [vmem:[%s402_s29 + $0x10] sm:$0xff]  ;;  %s1499_s30 = sand.u32 1, %s1259_s14  }
  0x29   : > { %440 = vmatpush.msra.mxu0 %v406_v1  ;;  %418 = vperm.xlu0 %1102, %v410_v2   ;;  %v404_v4 = vld [vmem:[%s402_s29 + $0x8] sm:$0xff]  ;;  %v403_v5 = vld [vmem:[%s402_s29] sm:$0xff]  ;;  %s1279_s29 = smov 4   ;;  %s974_s11 = sshll.u32 %s1499_s30, 4 }
  0x2a   : > { %v409_v7 = vld [vmem:[%s1575_s2] sm:$0xff]  ;;  %v468_v25 = vld [vmem:[%s1576_s3 + $0x8] sm:$0xff]  ;;  %v988_v52 = vld [vmem:[%s1576_s3 + $0x10] sm:$0xff]  ;;  %s390_s12 = scalar_lea.vmem [#allocation7], %s974_s11 }
  0x2b   : > { %441 = vmatpush.msra.mxu0 %v405_v3  ;;  %v467_v23 = vld [vmem:[%s1576_s3] sm:$0xff]  ;;  %v989_v54 = vld [vmem:[%s1576_s3 + $0x18] sm:$0xff]  ;;  %s832_s21 = sshll.u32 %s390_s12, 4  ;;  %s833_s21 = int_to_ptr.vmem [resolvable:$true] %s832_s21 }
  0x2c   : > { %v1002_v17 = vld [vmem:[%s1576_s3 + $0x20] sm:$0xff] }
  0x2d   : > { %442 = vmatpush.msra.mxu0 %v404_v4 }
  0x2f   : > { %443 = vmatpush.msra.mxu0 %v403_v5 }
  0x30   : > { %978 = vmatmul.msk.f32.vlgmr.msra.gmra.mxu0 %vm421_vm0, %v407_v6 }
  0x31   : > { %413 = vperm.xlu0 %1102, %v409_v7  }
  0x38   : > { %979 = vmatmul.msk.f32.gmra.mxu0 %vm421_vm0, %v408_v8  ;;  %v1005_v8 = vld [vmem:[%s1558_s4 + $0x28] sm:$0xff] }
  0x39   : > { %478 = vperm.xlu0 %1102, %v470_v9  }
  0x41   : > { %551 = vperm.xlu0 %1102, %v547_v10   ;;  %v1014_v10 = vld [vmem:[%s1560_s6 + $0x20] sm:$0xff] }
  0x9b   : > { %v419_v12 = vpop.permute.xlu0 %418 }
  0xa3   : > { %v414_v15 = vpop.permute.xlu0 %413 }
  0xab   : > { %v479_v29 = vpop.permute.xlu0 %478 }
  0xad   : > { %v445_v11 = vpop.f32.mrf.mxu0 }
  0xae   : > { %v446_v16 = vadd.f32 %v445_v11, %v414_v15  ;;  %v1004_v11 = vld [vmem:[%s1558_s4 + $0x20] sm:$0xff] }
  0xb3   : > { %v552_v39 = vpop.permute.xlu0 %551 }
  0xb5   : > { %v448_v13 = vpop.f32.mrf.mxu0 }
  0xb6   : > { %v449_v14 = vadd.f32 %v448_v13, %v419_v12  ;;  %v784_v12 = vld [vmem:[%s1562_s8] sm:$0xff]  ;;  %v1015_v13 = vld [vmem:[%s1560_s6 + $0x28] sm:$0xff] }
  0xb8   : > { %456 = vrot.lane.b32.xlu2 %v449_v14, %s1274_s25  ;;  %463 = vrot.lane.b32.xlu1 %v449_v14, %s1275_s27 }
  0xc0   : > { %454 = vrot.lane.b32.xlu2 %v446_v16, %s1274_s25  ;;  %461 = vrot.lane.b32.xlu1 %v446_v16, %s1275_s27  ;;  %s1277_s27 = smov 2   ;;  %s1278_s25 = smov 124  }
  0xc8   : > { %473 = vperm.xlu1 %1103, %v469_v19   ;;  %556 = vperm.xlu2 %1104, %v548_v26  }
 0x112   : > { %v457_v21 = vpop.permute.xlu2 %456 }
 0x11a   : > { %v455_v24 = vpop.permute.xlu2 %454 }
 0x122   : > { %v557_v42 = vpop.permute.xlu2 %556 }
 0x12a   : > { %v464_v20 = vpop.permute.xlu1 %463 }
 0x12b   : > { %980 = vmatpush.msk.msra.mxu1 %vm460_vm1, %v464_v20  ;;  %v1003_v20 = vld [vmem:[%s1576_s3 + $0x28] sm:$0xff] }
 0x132   : > { %v462_v22 = vpop.permute.xlu1 %461 }
 0x133   : > { %981 = vmatpush.msk.msra.mxu1 %vm460_vm1, %v462_v22 }
 0x135   : > { %500 = vmatpush.msra.mxu1 %v449_v14 }
 0x137   : > { %501 = vmatpush.msra.mxu1 %v446_v16 }
 0x139   : > { %982 = vmatpush.msk.msra.mxu1 %vm453_vm2, %v457_v21 }
 0x13a   : > { %v474_v28 = vpop.permute.xlu1 %473 }
 0x13b   : > { %983 = vmatpush.msk.msra.mxu1 %vm453_vm2, %v455_v24 }
 0x13c   : > { %984 = vmatmul.msk.f32.vlgmr.msra.gmra.mxu1 %vm481_vm3, %v467_v23 }
 0x144   : > { %985 = vmatmul.msk.f32.gmra.mxu1 %vm481_vm3, %v468_v25 }
 0x1b9   : > { %v505_v27 = vpop.f32.mrf.mxu1 }
 0x1ba   : > { %v506_v31 = vadd.f32 %v505_v27, %v474_v28  ;;  %v733_v28 = vld [vmem:[#allocation5 + $0x20] sm:$0xff] }
 0x1bc   : > { %v511_v34 = vmax.f32 %v506_v31, 0.0 }
 0x1c1   : > { %v508_v30 = vpop.f32.mrf.mxu1 }
 0x1c2   : > { %v509_v32 = vadd.f32 %v508_v30, %v479_v29  ;;  %v734_v29 = vld [vmem:[#allocation5 + $0x28] sm:$0xff] }
 0x1c4   : > { %v512_v33 = vmax.f32 %v509_v32, 0.0 }
 0x1c6   : > { %536 = vmatpush.msra.mxu2 %v512_v33 }
 0x1c8   : > { %537 = vmatpush.msra.mxu2 %v511_v34 }
 0x1c9   : > { %986 = vmatmul.msk.f32.vlgmr.msra.gmra.mxu2 %vm515_vm4, %v513_v35 }
 0x1d1   : > { %987 = vmatmul.msk.f32.gmra.mxu2 %vm515_vm4, %v514_v36 }
 0x24c   : > { %v539_v37 = vpop.f32.mrf.mxu2 }
 0x24d   : > { %v545_v38 = vadd.f32 %v539_v37, %v446_v16 }
 0x24f   : > { %v559_v40 = vadd.f32 %v552_v39, %v545_v38  ;;  %v783_v38 = vld [vmem:[%s1561_s7] sm:$0xff] }
 0x251   : > { %569 = vrot.lane.b32.xlu2 %v559_v40, %s1276_s26 }
 0x254   : > { %v542_v41 = vpop.f32.mrf.mxu2 }
 0x255   : > { %v546_v43 = vadd.f32 %v542_v41, %v449_v14 }
 0x257   : > { %v560_v45 = vadd.f32 %v557_v42, %v546_v43 }
 0x259   : > { %588 = vperm.xlu2 %1104, %v991_v44   ;;  %564 = vrot.lane.b32.xlu0 %v560_v45, %s1277_s27 }
 0x25a   : > { %571 = vrot.lane.b32.xlu1 %v560_v45, %s1276_s26  ;;  %s1025_s26 = sshll.u32 %s1358_s17, 4 }
 0x261   : > { %661 = vperm.xlu2 %1104, %v1000_v46   ;;  %583 = vperm.xlu0 %1102, %v990_v47  }
 0x262   : > { %562 = vrot.lane.b32.xlu1 %v559_v40, %s1277_s27  ;;  %s831_s27 = scalar_lea.hbm %s1563_s9, %s1025_s26 }
 0x263   : > { %s834_s28 = sshll.u32 %s831_s27, 4  ;;  %s835_s28 = int_to_ptr.hbm [resolvable:$true] %s834_s28 }
 0x264   : > { %s1179_s11 = sshra.s32 %s835_s28, 4  ;;  %s1180_s11 = int_to_ptr.hbm [resolvable:$true] %s1179_s11 }
 0x265   : > { %s1181_s0 = scalar_lea.hbm %s1180_s11, 16  ;;  %p1186_p3 = scmp.lt.s32.totalorder %s1180_s11, %s1563_s9 }
 0x266   : > { %p1182_p0 = scmp.ne.s32.totalorder %s1180_s11, %s1181_s0 }
 0x268   : > { %p1183_p1 = pnand %p1182_p0, %p1375_p5 }
 0x26a   : > { %666 = vperm.xlu1 %1103, %v1001_v48   ;;  %p1184_p2 = pneg %p1183_p1 }
 0x2ab   : > { %v570_v50 = vpop.permute.xlu2 %569 }
 0x2b3   : > { %v589_v56 = vpop.permute.xlu2 %588 }
 0x2bb   : > { %v662_v3 = vpop.permute.xlu2 %661 }
 0x2cb   : > { %v565_v51 = vpop.permute.xlu0 %564 }
 0x2cc   : > { %v572_v49 = vpop.permute.xlu1 %571 }
 0x2cd   : > { %992 = vmatpush.msk.msra.mxu3 %vm568_vm5, %v572_v49 }
 0x2cf   : > { %993 = vmatpush.msk.msra.mxu3 %vm568_vm5, %v570_v50 }
 0x2d1   : > { %609 = vmatpush.msra.mxu3 %v560_v45 }
 0x2d3   : > { %610 = vmatpush.msra.mxu3 %v559_v40  ;;  %v584_v57 = vpop.permute.xlu0 %583 }
 0x2d4   : > { %v563_v53 = vpop.permute.xlu1 %562 }
 0x2d5   : > { %994 = vmatpush.msk.msra.mxu3 %vm561_vm6, %v565_v51 }
 0x2d7   : > { %995 = vmatpush.msk.msra.mxu3 %vm561_vm6, %v563_v53 }
 0x2d8   : > { %996 = vmatmul.msk.f32.vlgmr.msra.gmra.mxu3 %vm481_vm3, %v988_v52 }
 0x2dc   : > { %v667_v7 = vpop.permute.xlu1 %666 }
 0x2e0   : > { %997 = vmatmul.msk.f32.gmra.mxu3 %vm481_vm3, %v989_v54 }
 0x35b   : > { %v614_v55 = vpop.f32.mrf.mxu3 }
 0x35c   : > { %v615_v59 = vadd.f32 %v614_v55, %v584_v57 }
 0x35e   : > { %v620_v62 = vmax.f32 %v615_v59, 0.0 }
 0x363   : > { %v617_v58 = vpop.f32.mrf.mxu3 }
 0x364   : > { %v618_v60 = vadd.f32 %v617_v58, %v589_v56 }
 0x366   : > { %v621_v61 = vmax.f32 %v618_v60, 0.0 }
 0x368   : > { %645 = vmatpush.msrb.mxu2 %v621_v61 }
 0x36a   : > { %646 = vmatpush.msrb.mxu2 %v620_v62 }
 0x36b   : > { %998 = vmatmul.msk.f32.vlgmr.msrb.gmra.mxu2 %vm515_vm4, %v623_v63 }
 0x373   : > { %999 = vmatmul.msk.f32.gmra.mxu2 %vm515_vm4, %v624_v0 }
 0x3ee   : > { %v648_v1 = vpop.f32.mrf.mxu2 }
 0x3ef   : > { %v654_v2 = vadd.f32 %v648_v1, %v559_v40 }
 0x3f1   : > { %v669_v4 = vadd.f32 %v662_v3, %v654_v2 }
 0x3f3   : > { %679 = vrot.lane.b32.xlu1 %v669_v4, %s1278_s25 }
 0x3f6   : > { %v651_v5 = vpop.f32.mrf.mxu2 }
 0x3f7   : > { %v655_v6 = vadd.f32 %v651_v5, %v560_v45 }
 0x3f9   : > { %v670_v9 = vadd.f32 %v667_v7, %v655_v6 }
 0x3fb   : > { %698 = vperm.xlu1 %1103, %v1005_v8   ;;  %674 = vrot.lane.b32.xlu2 %v670_v9, %s1279_s29 }
 0x3fc   : > { %681 = vrot.lane.b32.xlu0 %v670_v9, %s1278_s25 }
 0x403   : > { %771 = vperm.xlu1 %1103, %v1014_v10   ;;  %693 = vperm.xlu2 %1104, %v1004_v11  }
 0x404   : > { %672 = vrot.lane.b32.xlu0 %v669_v4, %s1279_s29  ;;  %s815_s29 = scalar_lea.sflag [#allocation4], %s1499_s30 }
 0x40b   : > { %787 = vperm.xlu2 %1104, %v784_v12  }
 0x40c   : > { %776 = vperm.xlu0 %1102, %v1015_v13  }
 0x455   : > { %v675_v16 = vpop.permute.xlu2 %674 }
 0x45d   : > { %v694_v18 = vpop.permute.xlu2 %693 }
 0x465   : > { %v680_v15 = vpop.permute.xlu1 %679 }
 0x46d   : > { %v699_v22 = vpop.permute.xlu1 %698 }
 0x46e   : > { %v682_v14 = vpop.permute.xlu0 %681 }
 0x46f   : > { %1006 = vmatpush.msk.msrb.mxu0 %vm678_vm7, %v682_v14 }
 0x471   : > { %1007 = vmatpush.msk.msrb.mxu0 %vm678_vm7, %v680_v15 }
 0x473   : > { %719 = vmatpush.msrb.mxu0 %v670_v9 }
 0x475   : > { %720 = vmatpush.msrb.mxu0 %v669_v4  ;;  %v772_v32 = vpop.permute.xlu1 %771 }
 0x476   : > { %v673_v19 = vpop.permute.xlu0 %672 }
 0x477   : > { %1008 = vmatpush.msk.msrb.mxu0 %vm671_vm8, %v675_v16 }
 0x479   : > { %1009 = vmatpush.msk.msrb.mxu0 %vm671_vm8, %v673_v19 }
 0x47a   : > { %1010 = vmatmul.msk.f32.vlgmr.msrb.gmra.mxu0 %vm481_vm3, %v1002_v17 }
 0x47e   : > { %v777_v36 = vpop.permute.xlu0 %776 }
 0x482   : > { %1011 = vmatmul.msk.f32.gmra.mxu0 %vm481_vm3, %v1003_v20 }
 0x4f7   : > { %v724_v21 = vpop.f32.mrf.mxu0 }
 0x4f8   : > { %v725_v24 = vadd.f32 %v724_v21, %v694_v18 }
 0x4fa   : > { %v730_v27 = vmax.f32 %v725_v24, 0.0 }
 0x4ff   : > { %v727_v23 = vpop.f32.mrf.mxu0 }
 0x500   : > { %v728_v25 = vadd.f32 %v727_v23, %v699_v22 }
 0x502   : > { %v731_v26 = vmax.f32 %v728_v25, 0.0 }
 0x504   : > { %755 = vmatpush.msrb.mxu1 %v731_v26 }
 0x506   : > { %756 = vmatpush.msrb.mxu1 %v730_v27 }
 0x507   : > { %1012 = vmatmul.msk.f32.vlgmr.msrb.gmra.mxu1 %vm515_vm4, %v733_v28 }
 0x50f   : > { %1013 = vmatmul.msk.f32.gmra.mxu1 %vm515_vm4, %v734_v29 }
 0x584   : > { %v758_v30 = vpop.f32.mrf.mxu1 }
 0x585   : > { %v764_v31 = vadd.f32 %v758_v30, %v669_v4 }
 0x587   : > { %v779_v33 = vadd.f32 %v772_v32, %v764_v31 }
 0x589   : > { %781 = vst [vmem:[%s390_s12] sm:$0xff] %v779_v33 }
 0x58c   : > { %v761_v34 = vpop.f32.mrf.mxu1 }
 0x58d   : > { %v765_v35 = vadd.f32 %v761_v34, %v670_v9 }
 0x58f   : > { %v780_v37 = vadd.f32 %v777_v36, %v765_v35 }
 0x591   : > { %782 = vst [vmem:[%s390_s12 + $0x8] sm:$0xff] %v780_v37  ;;  %807 = vmatpush.msrb.mxu3 %v780_v37  ;;  %s1185_s12 = scalar_lea.hbm %s1563_s9, 32 }
 0x592   : > { %p1187_p4 = scmp.lt.s32.totalorder %s1185_s12, %s1181_s0 }
 0x593   : > { %808 = vmatpush.msrb.mxu3 %v779_v33 }
 0x594   : > { %1016 = vmatmul.msk.f32.vlgmr.msrb.gmra.mxu3 %vm515_vm4, %v783_v38  ;;  %p1188_p7 = por %p1187_p4, %p1186_p3 }
 0x596   : > { %p1189_p8 = pnand %p1188_p7, %p1184_p2 }
 0x598   : > { %1192 = shalt.err (!%p1189_p8)
}
 0x599   : > { %s1280_s26 = smov 128   ;;  %s1281_s22 = smov 8   ;;  %v788_v39 = vpop.permute.xlu2 %787 }
 0x59a   : > { %1034 = dma.vmem_to_hbm [thread:$0]  (%p1375_p5), %s833_s21, 256, %s835_s28, %s815_s29, %s1280_s26, %s1280_s26, %s1281_s22  }
 0x59b   : > { %s975_s25 = sshll.u32 %s1499_s30, 3  ;;  %s1021_s27 = sshll.u32 %s1358_s17, 3 }
 0x59c   : > { %s847_s1 = scalar_lea.hbm %s1564_s10, %s1021_s27  ;;  %s397_s2 = scalar_lea.vmem [#allocation8], %s975_s25 }
 0x59d   : > { %s849_s0 = sshll.u32 %s397_s2, 4  ;;  %s851_s11 = sshll.u32 %s847_s1, 4  ;;  %s850_s0 = int_to_ptr.vmem [resolvable:$true] %s849_s0  ;;  %s852_s11 = int_to_ptr.hbm [resolvable:$true] %s851_s11 }
 0x59e   : > { %s820_s12 = scalar_lea.sflag [#allocation9], %s1499_s30  ;;  %s1207_s3 = sshra.s32 %s852_s11, 4  ;;  %s1208_s3 = int_to_ptr.hbm [resolvable:$true] %s1207_s3 }
 0x59f   : > { %s1209_s21 = scalar_lea.hbm %s1208_s3, 8  ;;  %s1213_s29 = scalar_lea.hbm %s1564_s10, 16 }
 0x5a0   : > { %p1210_p9 = scmp.ne.s32.totalorder %s1208_s3, %s1209_s21  ;;  %p1214_p12 = scmp.lt.s32.totalorder %s1208_s3, %s1564_s10 }
 0x5a1   : > { %p1215_p13 = scmp.lt.s32.totalorder %s1213_s29, %s1209_s21 }
 0x5a2   : > { %p1211_p10 = pnand %p1210_p9, %p1375_p5 }
 0x5a3   : > { %p1216_p0 = por %p1215_p13, %p1214_p12 }
 0x5a4   : > { %p1212_p11 = pneg %p1211_p10 }
 0x5a6   : > { %p1217_p1 = pnand %p1216_p0, %p1212_p11 }
 0x617   : > { %v810_v40 = vpop.f32.mrf.mxu3 }
 0x618   : > { %v811_v41 = vadd.f32 %v810_v40, %v788_v39 }
 0x61a   : > { %813 = vst [vmem:[%s397_s2] sm:$0xff] %v811_v41 }
 0x61b   : > { %1220 = shalt.err (!%p1217_p1)
}
 0x61c   : > { %1035 = dma.vmem_to_hbm [thread:$0]  (%p1375_p5), %s850_s0, 128, %s852_s11, %s820_s12  }
 0x61d PF: > { %p1056_p2 = scmp.ge.s32.totalorder %s1267_s16, 2  ;;  %s863_s30 = sand.u32 1, %s1255_s13  }
 0x61e   : > { %s864_s25 = scalar_lea.sflag [#allocation4], %s863_s30 }
 0x61f   : > { %p1046_p3 = pnand %p1056_p2, %p1379_p6 }
 0x621   : > { %p1047_p4 = pneg %p1046_p3 }
 0x623   : > { %1246 = dma.done.wait (%p1047_p4), %s864_s25, 256  }
 0x624   : > { %1248 = vsyncadd (%p1047_p4), %s864_s25, 4294967040  ;;  %s874_s3 = scalar_lea.sflag [#allocation9], %s863_s30 }
 0x625   : > { %1250 = dma.done.wait (%p1047_p4), %s874_s3, 128  }
 0x626   : > { %1252 = vsyncadd (%p1047_p4), %s874_s3, 4294967168  ;;  %s1577_s23 = sld [smem:[#allocation14_spill]]  ;;  %p26_p5 = scmp.ge.s32.totalorder %s1362_s19, 4  }
 0x627   : > { %s1578_s13 = smov %s1259_s14  ;;  %s1579_s14 = smov %s1263_s15 }
 0x628   : > { %s1581_s16 = smov %s1362_s19  ;;  %28 = sbr.rel (!%p26_p5) target bundleno = 12 (0xc), region = 125 }
 0x62c   : > { %s1580_s15 = smov %s1577_s23 }
 0x62d   :  { %880 = vsyncpa [#allocation3], 1 }
 0x62e   :  { %882 = vsyncpa [#allocation3 + $0x1], 1 }
 0x62f   :  { %883 = vsyncpa [#allocation6], 1 }
 0x630   :  { %884 = vsyncpa [#allocation4], 1 }
 0x631   :  { %886 = vsyncpa [#allocation4 + $0x1], 1 }
 0x632   :  { %887 = vsyncpa [#allocation9], 1 }
 0x633   :  { %889 = vsyncpa [#allocation9 + $0x1], 1 }

</bundles_post_ra>
